<compile_context>
chip_gen: v6e
topology: v6e:2x2x1
jax: 0.10.0
libtpu: 0.0.40
codegen_flags: <defaults>
</compile_context>

<pallas_src>
import functools

import jax
import jax.numpy as jnp
from jax import lax
from jax.experimental import pallas as pl
from jax.experimental.pallas import tpu as pltpu

LANE = 128                    # vreg lane width
SUBLANE = 8                   # f32 sublanes per vreg
GRANULE = SUBLANE * LANE      # 1024 elements: minimum lane-dense slab
MAX_TM = 4096                 # rows per grid step (multiple of 16 for a future bf16 tile path)


def _bce_partial_kernel(x_ref, y_ref, o_ref, *, tm, tail_rows):
    """Write one (8,128) slab of partial BCE-with-logits sums for this block.

    x_ref: (tm, 128) logits in their native HBM dtype (bf16/f16/f32).
    y_ref: (tm, 128) labels in their narrow HBM dtype (int8/bool/...).
    tail_rows: number of valid rows in the *last* grid block (static).
    """
    x = x_ref[...].astype(jnp.float32)          # cast on the VPU, not in HBM
    y = y_ref[...].astype(jnp.float32)

    # Numerically-stable BCEWithLogits (log1p form, matches torch):
    loss = jnp.maximum(x, 0.0) - x * y + jnp.log1p(jnp.exp(-jnp.abs(x)))

    def _fold(v):
        # Pure-VPU partial reduction: fold tm rows into one (8,128) vreg slab.
        return jnp.sum(v.reshape(tm // SUBLANE, SUBLANE, LANE), axis=0)

    if tail_rows == tm:
        # Every block (including the last) is completely full: no masking at
        # all anywhere on the hot path.
        o_ref[0] = _fold(loss)
    else:
        i = pl.program_id(0)
        last = pl.num_programs(0) - 1

        @pl.when(i < last)
        def _():
            # Interior blocks can never contain invalid rows.
            o_ref[0] = _fold(loss)

        @pl.when(i == last)
        def _():
            # Partial edge block: rows >= tail_rows are BlockSpec padding
            # (uninitialized VMEM).  Mask with a select (NOT a multiply) so
            # NaN/Inf garbage cannot propagate; one iota + one compare only.
            row = lax.broadcasted_iota(jnp.int32, (tm, LANE), 0)
            o_ref[0] = _fold(jnp.where(row < tail_rows, loss, 0.0))


def bce_with_logits_loss(logits, labels):
    """Equivalent of BCELossWrapper.forward.

    logits: (N, 1, H, W), any float dtype (streamed to the kernel natively).
    labels: (N, H, W); keep them narrow (int8/bool) in HBM -- callers holding
            f32 labels should downcast upstream, not inside this wrapper.
    """
    if logits.ndim != labels.ndim + 1 or logits.shape[1] != 1:
        raise ValueError("expected logits (N,1,H,W) and labels (N,H,W)")

    # labels.unsqueeze(1) only inserts a size-1 axis; flattening both keeps
    # the element correspondence, so no dtype cast / data movement here.
    x_flat = logits.reshape(-1)
    y_flat = labels.reshape(-1)
    n = x_flat.shape[0]
    n_aligned = (n // GRANULE) * GRANULE

    total = jnp.zeros((), jnp.float32)

    if n_aligned:
        rows = n_aligned // LANE                 # multiple of 8
        if n_aligned == n:
            x2 = x_flat.reshape(rows, LANE)
            y2 = y_flat.reshape(rows, LANE)
        else:
            # Aligned prefix only (no full-array jnp.pad / padding writes);
            # the <1024-element ragged tail is folded in below in plain JAX.
            x2 = x_flat[:n_aligned].reshape(rows, LANE)
            y2 = y_flat[:n_aligned].reshape(rows, LANE)

        tm = min(MAX_TM, rows)                   # multiple of 8
        num_blocks = pl.cdiv(rows, tm)
        tail_rows = rows - (num_blocks - 1) * tm  # valid rows in the last block

        kernel = functools.partial(_bce_partial_kernel, tm=tm, tail_rows=tail_rows)

        partial = pl.pallas_call(
            kernel,
            out_shape=jax.ShapeDtypeStruct((num_blocks, SUBLANE, LANE), jnp.float32),
            grid_spec=pltpu.PrefetchScalarGridSpec(
                num_scalar_prefetch=0,
                grid=(num_blocks,),
                in_specs=[
                    pl.BlockSpec((tm, LANE), lambda i: (i, 0)),
                    pl.BlockSpec((tm, LANE), lambda i: (i, 0)),
                ],
                out_specs=pl.BlockSpec((1, SUBLANE, LANE), lambda i: (i, 0, 0)),
            ),
            compiler_params=pltpu.CompilerParams(
                # Independent per-block partial sums.
                # TODO(synk): on v7x switch this axis to pltpu.CORE_PARALLEL
                # (or pl.core_map over a TC mesh) so both TensorCores share
                # the 3.2 TB/s HBM; plain "parallel" is a no-op for codegen.
                dimension_semantics=("parallel",),
                # Headroom for the 4096-row blocks on v5e (16 MiB default
                # scoped VMEM) and for Mosaic elementwise temporaries.
                vmem_limit_bytes=32 * 1024 * 1024,
            ),
        )(x2, y2)

        total = total + jnp.sum(partial)

    if n_aligned != n:
        # Ragged tail (< 1024 elements): negligible work, plain JAX.
        xt = x_flat[n_aligned:].astype(jnp.float32)
        yt = y_flat[n_aligned:].astype(jnp.float32)
        total = total + jnp.sum(
            jnp.maximum(xt, 0.0) - xt * yt + jnp.log1p(jnp.exp(-jnp.abs(xt))))

    return total / jnp.float32(n)


def _reference(logits, labels):
    y = labels[:, None, ...].astype(jnp.float32)
    x = logits.astype(jnp.float32)
    return jnp.mean(jnp.maximum(x, 0.0) - x * y + jnp.log1p(jnp.exp(-jnp.abs(x))))


if __name__ == "__main__":
    key = jax.random.PRNGKey(0)
    k1, k2, k3, k4, k5, k6 = jax.random.split(key, 6)

    # Test 1: small, 1024-aligned (2*32*32 = 2048 elems) -> single full block,
    # no mask, no tail.  Labels stay narrow int8 in HBM.
    logits1 = jax.random.normal(k1, (2, 1, 32, 32), dtype=jnp.float32)
    labels1 = (jax.random.uniform(k2, (2, 32, 32)) > 0.5).astype(jnp.int8)
    loss1 = jax.block_until_ready(bce_with_logits_loss(logits1, labels1))
    ref1 = _reference(logits1, labels1)
    assert jnp.allclose(loss1, ref1, atol=1e-6, rtol=1e-4), (loss1, ref1)

    # Test 2: non-1024-multiple element count (3*30*30 = 2700) -> kernel on the
    # aligned prefix plus the plain-JAX ragged-tail path.
    logits2 = jax.random.normal(k3, (3, 1, 30, 30), dtype=jnp.float32)
    labels2 = (jax.random.uniform(k4, (3, 30, 30)) > 0.5).astype(jnp.int8)
    loss2 = jax.block_until_ready(bce_with_logits_loss(logits2, labels2))
    ref2 = _reference(logits2, labels2)
    assert jnp.allclose(loss2, ref2, atol=1e-6, rtol=1e-4), (loss2, ref2)

    # Test 3: bf16 logits (native-dtype streaming), multi-block grid with a
    # partial last block (4*384*384 = 589824 elems -> 4608 rows, tm=4096,
    # 2 blocks, 512-row masked tail block).
    logits3 = jax.random.normal(k5, (4, 1, 384, 384), dtype=jnp.bfloat16)
    labels3 = (jax.random.uniform(k6, (4, 384, 384)) > 0.5).astype(jnp.int8)
    loss3 = jax.block_until_ready(bce_with_logits_loss(logits3, labels3))
    ref3 = _reference(logits3, labels3)
    assert jnp.allclose(loss3, ref3, atol=1e-6, rtol=1e-4), (loss3, ref3)

    print("KERNEL_OK")
</pallas_src>

<mosaic_0001>
module attributes {stable_mosaic.version = 11 : i64} {
  func.func @_bce_partial_kernel(%arg0: i32, %arg1: memref<16x128xf32, #tpu.memory_space<vmem>>, %arg2: memref<16x128xi8, #tpu.memory_space<vmem>>, %arg3: memref<1x8x128xf32, #tpu.memory_space<vmem>>) attributes {dimension_semantics = [#tpu.dimension_semantics<parallel>], iteration_bounds = array<i64: 1>, scalar_prefetch = 0 : i64, scratch_operands = 0 : i64, tpu.core_type = #tpu.core_type<tc>, window_params = [{transform_indices = @transform_0, window_bounds = array<i64: 16, 128>}, {transform_indices = @transform_1, window_bounds = array<i64: 16, 128>}, {transform_indices = @transform_2, window_bounds = array<i64: 1, 8, 128>}]} {
    %c0 = arith.constant 0 : index
    %c0_0 = arith.constant 0 : index
    %0 = vector.load %arg1[%c0, %c0_0] : memref<16x128xf32, #tpu.memory_space<vmem>>, vector<16x128xf32>
    %c0_1 = arith.constant 0 : index
    %c0_2 = arith.constant 0 : index
    %1 = vector.load %arg2[%c0_1, %c0_2] : memref<16x128xi8, #tpu.memory_space<vmem>>, vector<16x128xi8>
    %2 = arith.sitofp %1 : vector<16x128xi8> to vector<16x128xf32>
    %cst = arith.constant 0.000000e+00 : f32
    %3 = vector.broadcast %cst : f32 to vector<16x128xf32>
    %4 = arith.maximumf %0, %3 : vector<16x128xf32>
    %5 = arith.mulf %0, %2 : vector<16x128xf32>
    %6 = arith.subf %4, %5 : vector<16x128xf32>
    %7 = math.absf %0 : vector<16x128xf32>
    %cst_3 = arith.constant 0.000000e+00 : f32
    %8 = vector.broadcast %cst_3 : f32 to vector<16x128xf32>
    %9 = arith.subf %8, %7 : vector<16x128xf32>
    %10 = math.exp %9 : vector<16x128xf32>
    %11 = math.log1p %10 : vector<16x128xf32>
    %12 = arith.addf %6, %11 : vector<16x128xf32>
    %13 = vector.shape_cast %12 : vector<16x128xf32> to vector<2x8x128xf32>
    %cst_4 = arith.constant dense<0.000000e+00> : vector<8x128xf32>
    %14 = vector.multi_reduction <add>, %13, %cst_4 [0] : vector<2x8x128xf32> to vector<8x128xf32>
    %c0_5 = arith.constant 0 : index
    %c0_6 = arith.constant 0 : index
    %c0_7 = arith.constant 0 : index
    %15 = vector.load %arg3[%c0_5, %c0_6, %c0_7] : memref<1x8x128xf32, #tpu.memory_space<vmem>>, vector<1x8x128xf32>
    %16 = vector.shape_cast %15 : vector<1x8x128xf32> to vector<8x128xf32>
    %17 = vector.shape_cast %14 : vector<8x128xf32> to vector<1x8x128xf32>
    tpu.vector_store %arg3[%c0_5, %c0_6, %c0_7], %17 {strides = array<i32>} : memref<1x8x128xf32, #tpu.memory_space<vmem>>, vector<1x8x128xf32>,
    return
  }
  func.func @transform_0(%arg0: i32) -> (i32, i32) {
    %c0_i32 = arith.constant 0 : i32
    %c0_i32_0 = arith.constant 0 : i32
    return %arg0, %c0_i32 : i32, i32
  }
  func.func @transform_1(%arg0: i32) -> (i32, i32) {
    %c0_i32 = arith.constant 0 : i32
    %c0_i32_0 = arith.constant 0 : i32
    return %arg0, %c0_i32 : i32, i32
  }
  func.func @transform_2(%arg0: i32) -> (i32, i32, i32) {
    %c0_i32 = arith.constant 0 : i32
    %c0_i32_0 = arith.constant 0 : i32
    %c0_i32_1 = arith.constant 0 : i32
    return %arg0, %c0_i32, %c0_i32_0 : i32, i32, i32
  }
}

</mosaic_0001>

<bundles_post_ra>
// kernel: tpu_custom_call.1
= control target key start
LH: loop header
LB: loop body
LE: loop exit
PB: predicated region body
PF: predicated region fallthrough
CT: control target
= control target key end

     0   :  { %7 = vsyncpa [#allocation3], 0  ;;  %s216_s0 = inlined_call_operand.hbm [shape: f32[16,128], index: 0, kind: input, shape index: {}]   ;;  %s217_s1 = inlined_call_operand.hbm [shape: s8[16,128], index: 1, kind: input, shape index: {}]   ;;  %s218_s2 = inlined_call_operand.hbm [shape: f32[1,8,128], index: 2, kind: output, shape index: {}]  }
   0x1   :  { %8 = vsyncpa [#allocation6], 0 }
   0x2   :  { %9 = vsyncpa [#allocation4], 0  ;;  %s185_s9 = smov [#allocation2]  }
   0x3   :  { %s15_s10 = sshll.u32 %s185_s9, 4  ;;  %s16_s10 = int_to_ptr.vmem [resolvable:$true] %s15_s10 }
   0x4   :  { %s127_s11 = scalar_lea.vmem %s16_s10, 256  ;;  %p132_p1 = scmp.lt.s32.totalorder %s16_s10, %s16_s10 }
   0x5   :  { %p128_p0 = scmp.ne.s32.totalorder %s16_s10, %s127_s11  ;;  %p133_p2 = scmp.lt.s32.totalorder %s127_s11, %s127_s11 }
   0x7   :  { %p134_p3 = por %p133_p2, %p132_p1 }
   0x9   :  { %p135_p4 = pnand %p134_p3, %p128_p0 }
   0xb   :  { %138 = shalt.err (!%p135_p4)
}
   0xc   :  { %s186_s12 = smov 128   ;;  %s187_s13 = smov 8  }
   0xd   :  { %21 = dma.hbm_to_vmem [thread:$0]  %s216_s0, 256, %s16_s10, [#allocation3], %s186_s12, %s186_s12, %s187_s13  }
   0xe   :  { %s188_s16 = smov [#allocation5]  }
   0xf   :  { %s27_s17 = sshll.u32 %s188_s16, 4  ;;  %s28_s17 = int_to_ptr.vmem [resolvable:$true] %s27_s17 }
  0x10   :  { %s147_s18 = scalar_lea.vmem %s28_s17, 64  ;;  %p152_p6 = scmp.lt.s32.totalorder %s28_s17, %s28_s17 }
  0x11   :  { %p148_p5 = scmp.ne.s32.totalorder %s28_s17, %s147_s18  ;;  %p153_p7 = scmp.lt.s32.totalorder %s147_s18, %s147_s18 }
  0x13   :  { %p154_p8 = por %p153_p7, %p152_p6 }
  0x15   :  { %p155_p9 = pnand %p154_p8, %p148_p5 }
  0x17   :  { %158 = shalt.err (!%p155_p9)
}
  0x18   :  { %s189_s19 = smov 32   ;;  %s190_s20 = smov 2  }
  0x19   :  { %33 = dma.hbm_to_vmem [thread:$0]  %s217_s1, 64, %s28_s17, [#allocation6], %s189_s19, %s189_s19, %s190_s20  }
  0x1a   :  { %179 = dma.done.wait [#allocation3], 256  }
  0x1b   :  { %180 = vsyncadd [#allocation3], 4294967040 }
  0x1c   :  { %181 = dma.done.wait [#allocation6], 64  }
  0x1d   :  { %182 = vsyncadd [#allocation6], 4294967232  ;;  %v40_v0 = vld [vmem:[#allocation2] sm:$0xff]  ;;  %v41_v1 = vld [vmem:[#allocation2 + $0x8] sm:$0xff]  ;;  %s191_s0 = smov [#allocation7]  }
  0x1e   :  { %v54_v2 = vand.u32 2147483647, %v40_v0  ;;  %v55_v3 = vand.u32 2147483647, %v41_v1  ;;  %v101_v10 = vld [vmem:[#allocation5] sm:$0xf]  }
  0x1f   :  { %v102_v13 = vunpack.c.0.s8 %v101_v10  ;;  %v103_v14 = vunpack.c.1.s8 %v101_v10  ;;  %v48_v20 = vmax.f32 %v40_v0, 0.0  ;;  %v49_v24 = vmax.f32 %v41_v1, 0.0  ;;  %s90_s1 = sshll.u32 %s191_s0, 4  ;;  %s91_s1 = int_to_ptr.vmem [resolvable:$true] %s90_s1 }
  0x20   :  { %v56_v4 = vsub.f32 0.0, %v54_v2  ;;  %v57_v5 = vsub.f32 0.0, %v55_v3  ;;  %s159_s23 = scalar_lea.vmem %s91_s1, 128  ;;  %p164_p11 = scmp.lt.s32.totalorder %s91_s1, %s91_s1 }
  0x21   :  { %v46_v16 = vcvt.s32.f32 %v102_v13  ;;  %v47_v18 = vcvt.s32.f32 %v103_v14  ;;  %p160_p10 = scmp.ne.s32.totalorder %s91_s1, %s159_s23  ;;  %p165_p12 = scmp.lt.s32.totalorder %s159_s23, %s159_s23 }
  0x22   :  { %v58_v6 = vmul.f32 1.442695, %v56_v4  ;;  %v60_v7 = vmul.f32 1.442695, %v57_v5 }
  0x23   :  { %v50_v21 = vmul.f32 %v46_v16, %v40_v0  ;;  %v51_v25 = vmul.f32 %v47_v18, %v41_v1  ;;  %p166_p13 = por %p165_p12, %p164_p11 }
  0x24   :  { %111 = vpow2.f32 %v58_v6 }
  0x25   :  { %113 = vpow2.f32 %v60_v7  ;;  %v52_v29 = vsub.f32 %v48_v20, %v50_v21  ;;  %v53_v32 = vsub.f32 %v49_v24, %v51_v25  ;;  %p167_p0 = pnand %p166_p13, %p160_p10 }
  0x31   :  { %v112_v8 = vpop.eup %111 }
  0x32   :  { %v114_v9 = vpop.eup %113  ;;  %v62_v11 = vadd.f32 1.0, %v112_v8  ;;  %v65_v15 = vmul.f32 -0.5, %v112_v8  ;;  %v68_v22 = vand.u32 2147483647, %v112_v8 }
  0x33   :  { %v71_v12 = vadd.f32 1.0, %v114_v9  ;;  %v74_v17 = vmul.f32 -0.5, %v114_v9  ;;  %v77_v26 = vand.u32 2147483647, %v114_v9 }
  0x34   :  { %115 = vlog2.f32 %v62_v11  ;;  %v66_v19 = vadd.f32 1.0, %v65_v15  ;;  %vm69_vm0 = vcmp.lt.f32.partialorder %v68_v22, 0.0004427343 }
  0x35   :  { %117 = vlog2.f32 %v71_v12  ;;  %v75_v23 = vadd.f32 1.0, %v74_v17  ;;  %vm78_vm1 = vcmp.lt.f32.partialorder %v77_v26, 0.0004427343 }
  0x36   :  { %v67_v27 = vmul.f32 %v112_v8, %v66_v19 }
  0x37   :  { %v76_v30 = vmul.f32 %v114_v9, %v75_v23 }
  0x41   :  { %v116_v28 = vpop.eup %115 }
  0x42   :  { %v118_v31 = vpop.eup %117  ;;  %v64_v33 = vmul.f32 0.6931472, %v116_v28 }
  0x43   :  { %v73_v34 = vmul.f32 0.6931472, %v118_v31 }
  0x44   :  { %v70_v35 = vsel %vm69_vm0, %v67_v27, %v64_v33 }
  0x45   :  { %v79_v36 = vsel %vm78_vm1, %v76_v30, %v73_v34  ;;  %v80_v37 = vadd.f32 %v70_v35, %v52_v29 }
  0x46   :  { %v81_v38 = vadd.f32 %v79_v36, %v53_v32 }
  0x48   :  { %v82_v39 = vadd.f32 %v81_v38, %v80_v37 }
  0x4a   :  { %83 = vst [vmem:[#allocation7] sm:$0xff] %v82_v39 }
  0x4b   :  { %170 = shalt.err (!%p167_p0)
}
  0x4c   :  { %93 = dma.vmem_to_hbm [thread:$0]  %s91_s1, 128, %s218_s2, [#allocation4]  }
  0x4d   :  { %183 = dma.done.wait [#allocation4], 128  }
  0x4e   :  { %184 = vsyncadd [#allocation4], 4294967168 }
  0x4f   :  { %97 = vsyncpa [#allocation3], 1 }
  0x50   :  { %98 = vsyncpa [#allocation6], 1 }
  0x51   :  { %99 = vsyncpa [#allocation4], 1 }

</bundles_post_ra>
